<compile_context>
chip_gen: v7x
topology: tpu7x:2x2x1
jax: 0.10.0
libtpu: 0.0.40
codegen_flags: <defaults>
</compile_context>

<pallas_src>
import functools

import jax
import jax.numpy as jnp
from jax.experimental import pallas as pl
from jax.experimental.pallas import tpu as pltpu


def _round_up(x, m):
    return ((x + m - 1) // m) * m


def _cdiv(a, b):
    return -(-a // b)


def actor_mlp_kernel(x_ref, w1_ref, b1_ref, w2_ref, b2_ref, w3_ref, b3_ref,
                     out_ref, *, apply_tanh=False):
    """Fused 3-layer MLP; whole working set (<~3 MiB) is VMEM-resident.

    Matmuls hit the MXU with f32 accumulation; bias-add / ReLU run on the VPU.
    Activations are cast to the weight dtype right before each dot so bf16
    weights take a single native MXU pass; everything else stays f32.
    """
    wdt = w1_ref.dtype
    x = x_ref[...].astype(wdt)
    h1 = jnp.dot(x, w1_ref[...], preferred_element_type=jnp.float32) + b1_ref[...]
    h1 = jnp.maximum(h1, 0.0)
    h2 = jnp.dot(h1.astype(wdt), w2_ref[...], preferred_element_type=jnp.float32) + b2_ref[...]
    h2 = jnp.maximum(h2, 0.0)
    out = jnp.dot(h2.astype(wdt), w3_ref[...], preferred_element_type=jnp.float32) + b3_ref[...]
    if apply_tanh:  # Actor.get_action() path; forward() leaves actions unbounded.
        out = jnp.tanh(out)
    out_ref[...] = out.astype(out_ref.dtype)


def prepare_actor_params(params, state_dim, action_dim, weight_dtype=jnp.bfloat16):
    """One-time parameter prep (hoisted out of the per-call forward path).

    Zero-pads state_dim / action_dim feature axes to lane multiples (128),
    reshapes biases to (1, N) rows, and casts weights to `weight_dtype`.
    bf16 weights are recommended on v5e/v6e/v7x alike (MXU is bf16-native on
    all three; halves weight DMA and VMEM). Biases stay f32. Keep the returned
    tuple as the canonical inference params.
    """
    w1, b1, w2, b2, w3, b3 = params
    hidden = w1.shape[1]
    sd_p = _round_up(state_dim, 128)
    ad_p = _round_up(action_dim, 128)

    w1_p = jnp.zeros((sd_p, hidden), weight_dtype).at[:state_dim, :].set(w1.astype(weight_dtype))
    w2_p = w2.astype(weight_dtype)
    w3_p = jnp.zeros((hidden, ad_p), weight_dtype).at[:, :action_dim].set(w3.astype(weight_dtype))
    b1_p = b1.reshape(1, hidden).astype(jnp.float32)
    b2_p = b2.reshape(1, hidden).astype(jnp.float32)
    b3_p = jnp.zeros((1, ad_p), jnp.float32).at[:, :action_dim].set(b3.astype(jnp.float32))
    return (w1_p, b1_p, w2_p, b2_p, w3_p, b3_p)


def _choose_batch_tiling(batch, batch_tile):
    """Pick (tile_rows, padded_batch).

    - multiple of 16 rows (whole packed bf16 vregs),
    - >=2 grid steps once batch >= 128 (dual-TC on v7x; near-free elsewhere),
    - balanced tiles so padding waste is < 16 rows.
    """
    b16 = _round_up(batch, 16)
    n_steps = max(_cdiv(b16, batch_tile), 2 if b16 >= 128 else 1)
    tb = _round_up(_cdiv(b16, n_steps), 16)
    n_steps = _cdiv(b16, tb)
    return tb, tb * n_steps


@functools.partial(
    jax.jit, static_argnames=("action_dim", "batch_tile", "apply_tanh", "out_dtype")
)
def actor_forward(state, prepped_params, action_dim, batch_tile=512,
                  apply_tanh=False, out_dtype=jnp.float32):
    """state: (batch, state_dim) f32 -> (batch, action_dim) `out_dtype`.

    `prepped_params` must come from prepare_actor_params (padded/cast once).
    The input pad is marked fusable into the pallas custom call.
    """
    w1, b1, w2, b2, w3, b3 = prepped_params
    batch, state_dim = state.shape
    sd_p, hidden = w1.shape
    ad_p = w3.shape[1]

    tb, b_p = _choose_batch_tiling(batch, batch_tile)

    # Batch/feature zero-pad. allow_input_fusion=[True,...] below lets XLA fuse
    # this producer into the pallas custom call instead of launching it as a
    # separate op with an extra HBM round trip.
    x_p = jnp.pad(state, ((0, b_p - batch), (0, sd_p - state_dim)))

    n_in = 7
    flops = 2 * b_p * (sd_p * hidden + hidden * hidden + hidden * ad_p)
    bytes_accessed = (
        x_p.size * x_p.dtype.itemsize
        + sum(int(p.size) * p.dtype.itemsize for p in prepped_params)
        + b_p * ad_p * jnp.dtype(out_dtype).itemsize
    )

    kernel = functools.partial(actor_mlp_kernel, apply_tanh=apply_tanh)

    out_p = pl.pallas_call(
        kernel,
        out_shape=jax.ShapeDtypeStruct((b_p, ad_p), out_dtype),
        grid=(b_p // tb,),
        in_specs=[
            pl.BlockSpec((tb, sd_p), lambda i: (i, 0)),        # x (batch-tiled)
            pl.BlockSpec((sd_p, hidden), lambda i: (0, 0)),    # w1 (VMEM-resident)
            pl.BlockSpec((1, hidden), lambda i: (0, 0)),       # b1
            pl.BlockSpec((hidden, hidden), lambda i: (0, 0)),  # w2
            pl.BlockSpec((1, hidden), lambda i: (0, 0)),       # b2
            pl.BlockSpec((hidden, ad_p), lambda i: (0, 0)),    # w3
            pl.BlockSpec((1, ad_p), lambda i: (0, 0)),         # b3
        ],
        out_specs=pl.BlockSpec((tb, ad_p), lambda i: (i, 0)),
        compiler_params=pltpu.CompilerParams(
            dimension_semantics=("parallel",),
            allow_input_fusion=[True] + [False] * (n_in - 1),
        ),
        cost_estimate=pl.CostEstimate(
            flops=flops,
            transcendentals=(b_p * ad_p if apply_tanh else 0),
            bytes_accessed=bytes_accessed,
        ),
    )(x_p, w1, b1, w2, b2, w3, b3)

    # Lane-dense 128-wide output inside the kernel (unmasked vst); slice the
    # real action columns / batch rows here.
    return out_p[:batch, :action_dim]


def init_actor_params(key, state_dim, hidden, action_dim):
    """Deterministic PyTorch-style Linear init: U(-1/sqrt(fan_in), 1/sqrt(fan_in))."""
    ks = jax.random.split(key, 6)

    def linear(kw, kb, fan_in, fan_out):
        bound = 1.0 / jnp.sqrt(jnp.float32(fan_in))
        w = jax.random.uniform(kw, (fan_in, fan_out), jnp.float32, -bound, bound)
        b = jax.random.uniform(kb, (fan_out,), jnp.float32, -bound, bound)
        return w, b

    w1, b1 = linear(ks[0], ks[1], state_dim, hidden)
    w2, b2 = linear(ks[2], ks[3], hidden, hidden)
    w3, b3 = linear(ks[4], ks[5], hidden, action_dim)
    return (w1, b1, w2, b2, w3, b3)


def _ref_bf16(state, params):
    """Reference mirroring the kernel's bf16-weight / f32-accumulate arithmetic."""
    w1, b1, w2, b2, w3, b3 = params
    wdt = jnp.bfloat16
    h = jnp.dot(state.astype(wdt), w1.astype(wdt), preferred_element_type=jnp.float32) + b1
    h = jnp.maximum(h, 0.0)
    h = jnp.dot(h.astype(wdt), w2.astype(wdt), preferred_element_type=jnp.float32) + b2
    h = jnp.maximum(h, 0.0)
    return jnp.dot(h.astype(wdt), w3.astype(wdt), preferred_element_type=jnp.float32) + b3


if __name__ == "__main__":
    # cheetah_run: obs dim 17, action dim 6; n_hidden_nodes defaults to 256.
    batch, state_dim, hidden, action_dim = 8, 17, 256, 6

    key = jax.random.PRNGKey(0)
    k_params, k_state = jax.random.split(key)
    params = init_actor_params(k_params, state_dim, hidden, action_dim)
    prepped = prepare_actor_params(params, state_dim, action_dim, weight_dtype=jnp.bfloat16)
    state = jax.random.normal(k_state, (batch, state_dim), jnp.float32)

    # --- inference-size batch (single grid step) ---
    out = jax.block_until_ready(actor_forward(state, prepped, action_dim))
    assert out.shape == (batch, action_dim)

    # Loose check vs the f32 PyTorch-equivalent forward (bf16 weights => ~1e-2 rel err).
    w1, b1, w2, b2, w3, b3 = params
    ref_f32 = jnp.maximum(state @ w1 + b1, 0.0)
    ref_f32 = jnp.maximum(ref_f32 @ w2 + b2, 0.0)
    ref_f32 = ref_f32 @ w3 + b3
    assert jnp.allclose(out, ref_f32, atol=5e-2, rtol=5e-2)

    # Tight check vs a bf16-weight / f32-accumulate reference.
    assert jnp.allclose(out, _ref_bf16(state, params), atol=1e-3, rtol=1e-3)

    # --- training-size batch (multi-step grid: balanced 16-multiple tiles,
    #     >=2 steps so v7x uses both TensorCores) ---
    big_batch = 300
    big_state = jax.random.normal(jax.random.PRNGKey(1), (big_batch, state_dim), jnp.float32)
    big_out = jax.block_until_ready(actor_forward(big_state, prepped, action_dim))
    assert big_out.shape == (big_batch, action_dim)
    assert jnp.allclose(big_out, _ref_bf16(big_state, params), atol=1e-3, rtol=1e-3)

    # TODO(synk): Adam optimizer / training update is host-side state, not part
    # of the forward pass, so it is intentionally not ported to Pallas.
    print("KERNEL_OK")
</pallas_src>

<mosaic_0001>
module attributes {stable_mosaic.version = 11 : i64} {
  func.func @actor_mlp_kernel(%arg0: i32, %arg1: memref<16x128xf32, #tpu.memory_space<vmem>>, %arg2: memref<128x256xbf16, #tpu.memory_space<vmem>>, %arg3: memref<1x256xf32, #tpu.memory_space<vmem>>, %arg4: memref<256x256xbf16, #tpu.memory_space<vmem>>, %arg5: memref<1x256xf32, #tpu.memory_space<vmem>>, %arg6: memref<256x128xbf16, #tpu.memory_space<vmem>>, %arg7: memref<1x128xf32, #tpu.memory_space<vmem>>, %arg8: memref<16x128xf32, #tpu.memory_space<vmem>>) attributes {dimension_semantics = [#tpu.dimension_semantics<parallel>], iteration_bounds = array<i64: 1>, scalar_prefetch = 0 : i64, scratch_operands = 0 : i64, tpu.core_type = #tpu.core_type<tc>, window_params = [{transform_indices = @transform_0, window_bounds = array<i64: 16, 128>}, {pipeline_mode = #tpu.pipeline_mode<synchronous>, transform_indices = @transform_1, window_bounds = array<i64: 128, 256>}, {pipeline_mode = #tpu.pipeline_mode<synchronous>, transform_indices = @transform_2, window_bounds = array<i64: 1, 256>}, {pipeline_mode = #tpu.pipeline_mode<synchronous>, transform_indices = @transform_3, window_bounds = array<i64: 256, 256>}, {pipeline_mode = #tpu.pipeline_mode<synchronous>, transform_indices = @transform_4, window_bounds = array<i64: 1, 256>}, {pipeline_mode = #tpu.pipeline_mode<synchronous>, transform_indices = @transform_5, window_bounds = array<i64: 256, 128>}, {pipeline_mode = #tpu.pipeline_mode<synchronous>, transform_indices = @transform_6, window_bounds = array<i64: 1, 128>}, {transform_indices = @transform_7, window_bounds = array<i64: 16, 128>}]} {
    %c0 = arith.constant 0 : index
    %c0_0 = arith.constant 0 : index
    %0 = vector.load %arg1[%c0, %c0_0] : memref<16x128xf32, #tpu.memory_space<vmem>>, vector<16x128xf32>
    %1 = arith.truncf %0 : vector<16x128xf32> to vector<16x128xbf16>
    %c0_1 = arith.constant 0 : index
    %c0_2 = arith.constant 0 : index
    %2 = vector.load %arg2[%c0_1, %c0_2] : memref<128x256xbf16, #tpu.memory_space<vmem>>, vector<128x256xbf16>
    %cst = arith.constant dense<0.000000e+00> : vector<16x256xf32>
    %3 = tpu.matmul %1, %2, %cst {dimension_numbers = #tpu.dot_dimension_numbers<[1], [0], [0], [1], [0, 0, 1, 1], [], []>} : vector<16x128xbf16>, vector<128x256xbf16>, vector<16x256xf32> -> vector<16x256xf32>
    %c0_3 = arith.constant 0 : index
    %c0_4 = arith.constant 0 : index
    %4 = vector.load %arg3[%c0_3, %c0_4] : memref<1x256xf32, #tpu.memory_space<vmem>>, vector<1x256xf32>
    %5 = vector.broadcast %4 : vector<1x256xf32> to vector<16x256xf32>
    %6 = arith.addf %3, %5 : vector<16x256xf32>
    %cst_5 = arith.constant 0.000000e+00 : f32
    %7 = vector.broadcast %cst_5 : f32 to vector<16x256xf32>
    %8 = arith.maximumf %6, %7 : vector<16x256xf32>
    %9 = arith.truncf %8 : vector<16x256xf32> to vector<16x256xbf16>
    %c0_6 = arith.constant 0 : index
    %c0_7 = arith.constant 0 : index
    %10 = vector.load %arg4[%c0_6, %c0_7] : memref<256x256xbf16, #tpu.memory_space<vmem>>, vector<256x256xbf16>
    %cst_8 = arith.constant dense<0.000000e+00> : vector<16x256xf32>
    %11 = tpu.matmul %9, %10, %cst_8 {dimension_numbers = #tpu.dot_dimension_numbers<[1], [0], [0], [1], [0, 0, 1, 1], [], []>} : vector<16x256xbf16>, vector<256x256xbf16>, vector<16x256xf32> -> vector<16x256xf32>
    %c0_9 = arith.constant 0 : index
    %c0_10 = arith.constant 0 : index
    %12 = vector.load %arg5[%c0_9, %c0_10] : memref<1x256xf32, #tpu.memory_space<vmem>>, vector<1x256xf32>
    %13 = vector.broadcast %12 : vector<1x256xf32> to vector<16x256xf32>
    %14 = arith.addf %11, %13 : vector<16x256xf32>
    %cst_11 = arith.constant 0.000000e+00 : f32
    %15 = vector.broadcast %cst_11 : f32 to vector<16x256xf32>
    %16 = arith.maximumf %14, %15 : vector<16x256xf32>
    %17 = arith.truncf %16 : vector<16x256xf32> to vector<16x256xbf16>
    %c0_12 = arith.constant 0 : index
    %c0_13 = arith.constant 0 : index
    %18 = vector.load %arg6[%c0_12, %c0_13] : memref<256x128xbf16, #tpu.memory_space<vmem>>, vector<256x128xbf16>
    %cst_14 = arith.constant dense<0.000000e+00> : vector<16x128xf32>
    %19 = tpu.matmul %17, %18, %cst_14 {dimension_numbers = #tpu.dot_dimension_numbers<[1], [0], [0], [1], [0, 0, 1, 1], [], []>} : vector<16x256xbf16>, vector<256x128xbf16>, vector<16x128xf32> -> vector<16x128xf32>
    %c0_15 = arith.constant 0 : index
    %c0_16 = arith.constant 0 : index
    %20 = vector.load %arg7[%c0_15, %c0_16] : memref<1x128xf32, #tpu.memory_space<vmem>>, vector<1x128xf32>
    %21 = vector.broadcast %20 : vector<1x128xf32> to vector<16x128xf32>
    %22 = arith.addf %19, %21 : vector<16x128xf32>
    %c0_17 = arith.constant 0 : index
    %c0_18 = arith.constant 0 : index
    %23 = vector.load %arg8[%c0_17, %c0_18] : memref<16x128xf32, #tpu.memory_space<vmem>>, vector<16x128xf32>
    tpu.vector_store %arg8[%c0_17, %c0_18], %22 {strides = array<i32>} : memref<16x128xf32, #tpu.memory_space<vmem>>, vector<16x128xf32>,
    return
  }
  func.func @transform_0(%arg0: i32) -> (i32, i32) {
    %c0_i32 = arith.constant 0 : i32
    %c0_i32_0 = arith.constant 0 : i32
    return %arg0, %c0_i32 : i32, i32
  }
  func.func @transform_1(%arg0: i32) -> (i32, i32) {
    %c0_i32 = arith.constant 0 : i32
    %c0_i32_0 = arith.constant 0 : i32
    %c0_i32_1 = arith.constant 0 : i32
    return %c0_i32, %c0_i32_0 : i32, i32
  }
  func.func @transform_2(%arg0: i32) -> (i32, i32) {
    %c0_i32 = arith.constant 0 : i32
    %c0_i32_0 = arith.constant 0 : i32
    %c0_i32_1 = arith.constant 0 : i32
    return %c0_i32, %c0_i32_0 : i32, i32
  }
  func.func @transform_3(%arg0: i32) -> (i32, i32) {
    %c0_i32 = arith.constant 0 : i32
    %c0_i32_0 = arith.constant 0 : i32
    %c0_i32_1 = arith.constant 0 : i32
    return %c0_i32, %c0_i32_0 : i32, i32
  }
  func.func @transform_4(%arg0: i32) -> (i32, i32) {
    %c0_i32 = arith.constant 0 : i32
    %c0_i32_0 = arith.constant 0 : i32
    %c0_i32_1 = arith.constant 0 : i32
    return %c0_i32, %c0_i32_0 : i32, i32
  }
  func.func @transform_5(%arg0: i32) -> (i32, i32) {
    %c0_i32 = arith.constant 0 : i32
    %c0_i32_0 = arith.constant 0 : i32
    %c0_i32_1 = arith.constant 0 : i32
    return %c0_i32, %c0_i32_0 : i32, i32
  }
  func.func @transform_6(%arg0: i32) -> (i32, i32) {
    %c0_i32 = arith.constant 0 : i32
    %c0_i32_0 = arith.constant 0 : i32
    %c0_i32_1 = arith.constant 0 : i32
    return %c0_i32, %c0_i32_0 : i32, i32
  }
  func.func @transform_7(%arg0: i32) -> (i32, i32) {
    %c0_i32 = arith.constant 0 : i32
    %c0_i32_0 = arith.constant 0 : i32
    return %arg0, %c0_i32 : i32, i32
  }
}

</mosaic_0001>

<bundles_post_ra>
// kernel: actor_forward.2
= control target key start
LH: loop header
LB: loop body
LE: loop exit
PB: predicated region body
PF: predicated region fallthrough
CT: control target
= control target key end

     0   :  { %s1105_s0 = inlined_call_operand.hbm [shape: bf16[128,256], index: 0, kind: input, shape index: {}]   ;;  %s1106_s1 = inlined_call_operand.vmem [shape: f32[1,256], index: 1, kind: input, shape index: {}]   ;;  %s1107_s2 = inlined_call_operand.hbm [shape: bf16[256,256], index: 2, kind: input, shape index: {}]   ;;  %s1108_s3 = inlined_call_operand.vmem [shape: f32[1,256], index: 3, kind: input, shape index: {}]   ;;  %s1109_s4 = inlined_call_operand.hbm [shape: bf16[256,128], index: 4, kind: input, shape index: {}]   ;;  %s1110_s5 = inlined_call_operand.vmem [shape: f32[1,128], index: 5, kind: input, shape index: {}]   ;;  %s1111_s6 = inlined_call_operand.hbm [shape: f32[8,17], index: 6, kind: input, shape index: {}]   ;;  %s1112_s7 = inlined_call_operand.<no memory space> [shape: f32[], index: 7, kind: input, shape index: {}]   ;;  %s1113_s8 = inlined_call_operand.vmem [shape: f32[16,128], index: 8, kind: output, shape index: {}]  }
   0x1   :  { %v13_v0 = vstv %s1112_s7 }
   0x2   :  { %14 = vsyncpa [#allocation8], 0 }
   0x3   :  { %15 = vsyncpa [#allocation10], 0 }
   0x4   :  { %16 = vsyncpa [#allocation13], 0  ;;  %s969_s29 = smov [#allocation9]   ;;  %s875_s11 = scalar_lea.hbm %s1105_s0, 2048 }
   0x5   :  { %s32_s30 = sshll.u32 %s969_s29, 4  ;;  %p876_p0 = scmp.ne.s32.totalorder %s1105_s0, %s875_s11  ;;  %s33_s30 = int_to_ptr.vmem [resolvable:$true] %s32_s30 }
   0x6   :  { %p879_p1 = scmp.lt.u32.totalorder %s875_s11, %s1105_s0 }
   0x8   :  { %p881_p2 = pnand %p879_p1, %p876_p0 }
   0xa   :  { %884 = shalt.err (!%p881_p2)
}
   0xb   :  { %s885_s16 = scalar_lea.vmem %s33_s30, 2048  ;;  %p890_p4 = scmp.lt.s32.totalorder %s33_s30, %s33_s30 }
   0xc   :  { %p886_p3 = scmp.ne.s32.totalorder %s33_s30, %s885_s16  ;;  %p891_p5 = scmp.lt.s32.totalorder %s885_s16, %s885_s16 }
   0xe   :  { %p892_p6 = por %p891_p5, %p890_p4 }
  0x10   :  { %p893_p7 = pnand %p892_p6, %p886_p3 }
  0x12   :  { %896 = shalt.err (!%p893_p7)
}
  0x13   :  { %s970_s17 = smov 128   ;;  %s971_s18 = smov 8  }
  0x14   :  { %38 = dma.hbm_to_vmem [thread:$0]  %s1105_s0, 2048, %s33_s30, [#allocation10], %s970_s17, %s970_s17, %s971_s18  }
  0x15   :  { %s972_s21 = smov [#allocation7]   ;;  %s973_s23 = smov [#allocation11]  }
  0x16   :  { %s23_s22 = sshll.u32 %s972_s21, 4  ;;  %s46_s24 = sshll.u32 %s973_s23, 4  ;;  %s24_s22 = int_to_ptr.vmem [resolvable:$true] %s23_s22  ;;  %s47_s24 = int_to_ptr.vmem [resolvable:$true] %s46_s24 }
  0x17   :  { %s897_s27 = scalar_lea.hbm %s1111_s6, 128 }
  0x18   :  { %p898_p8 = scmp.ne.s32.totalorder %s1111_s6, %s897_s27  ;;  %p901_p9 = scmp.lt.u32.totalorder %s897_s27, %s1111_s6 }
  0x1a   :  { %p903_p10 = pnand %p901_p9, %p898_p8 }
  0x1c   :  { %906 = shalt.err (!%p903_p10)
}
  0x1d   :  { %s907_s0 = scalar_lea.vmem %s24_s22, 128  ;;  %p912_p12 = scmp.lt.s32.totalorder %s24_s22, %s24_s22 }
  0x1e   :  { %p908_p11 = scmp.ne.s32.totalorder %s24_s22, %s907_s0  ;;  %p913_p13 = scmp.lt.s32.totalorder %s907_s0, %s907_s0 }
  0x20   :  { %p914_p0 = por %p913_p13, %p912_p12 }
  0x22   :  { %p915_p1 = pnand %p914_p0, %p908_p11 }
  0x24   :  { %918 = shalt.err (!%p915_p1)
}
  0x25   :  { %26 = dma.hbm_to_vmem [thread:$0]  %s1111_s6, 128, %s24_s22, [#allocation8]  }
  0x26   :  { %s919_s14 = scalar_lea.hbm %s1107_s2, 4096 }
  0x27   :  { %p920_p2 = scmp.ne.s32.totalorder %s1107_s2, %s919_s14  ;;  %p923_p3 = scmp.lt.u32.totalorder %s919_s14, %s1107_s2 }
  0x29   :  { %p925_p4 = pnand %p923_p3, %p920_p2 }
  0x2b   :  { %928 = shalt.err (!%p925_p4)
}
  0x2c   :  { %s929_s21 = scalar_lea.vmem %s47_s24, 4096  ;;  %p934_p6 = scmp.lt.s32.totalorder %s47_s24, %s47_s24 }
  0x2d   :  { %p930_p5 = scmp.ne.s32.totalorder %s47_s24, %s929_s21  ;;  %p935_p7 = scmp.lt.s32.totalorder %s929_s21, %s929_s21 }
  0x2f   :  { %p936_p8 = por %p935_p7, %p934_p6 }
  0x31   :  { %p937_p9 = pnand %p936_p8, %p930_p5 }
  0x33   :  { %940 = shalt.err (!%p937_p9)
}
  0x34   :  { %52 = dma.hbm_to_vmem [thread:$0]  %s1107_s2, 4096, %s47_s24, [#allocation10], %s970_s17, %s970_s17, %s971_s18  }
  0x35   :  { %s974_s23 = smov [#allocation12]   ;;  %s941_s28 = scalar_lea.hbm %s1109_s4, 2048 }
  0x36   :  { %s60_s25 = sshll.u32 %s974_s23, 4  ;;  %p942_p10 = scmp.ne.s32.totalorder %s1109_s4, %s941_s28  ;;  %s61_s25 = int_to_ptr.vmem [resolvable:$true] %s60_s25 }
  0x37   :  { %p945_p11 = scmp.lt.u32.totalorder %s941_s28, %s1109_s4 }
  0x39   :  { %p947_p12 = pnand %p945_p11, %p942_p10 }
  0x3b   :  { %950 = shalt.err (!%p947_p12)
}
  0x3c   :  { %s951_s30 = scalar_lea.vmem %s61_s25, 2048  ;;  %p956_p0 = scmp.lt.s32.totalorder %s61_s25, %s61_s25 }
  0x3d   :  { %p952_p13 = scmp.ne.s32.totalorder %s61_s25, %s951_s30  ;;  %p957_p1 = scmp.lt.s32.totalorder %s951_s30, %s951_s30 }
  0x3f   :  { %p958_p2 = por %p957_p1, %p956_p0 }
  0x41   :  { %p959_p3 = pnand %p958_p2, %p952_p13 }
  0x43   :  { %962 = shalt.err (!%p959_p3)
}
  0x44   :  { %s975_s2 = smov 64   ;;  %s976_s17 = smov 4  }
  0x45   :  { %66 = dma.hbm_to_vmem [thread:$0]  %s1109_s4, 2048, %s61_s25, [#allocation13], %s975_s2, %s975_s2, %s976_s17  }
  0x46   :  { %963 = dma.done.wait [#allocation8], 128  }
  0x47   :  { %964 = vsyncadd [#allocation8], 4294967168 }
  0x48   :  { %965 = dma.done.wait [#allocation10], 6144  }
  0x49   :  { %966 = vsyncadd [#allocation10], 4294961152 }
  0x4a   :  { %967 = dma.done.wait [#allocation13], 2048  }
  0x4b   :  { %968 = vsyncadd [#allocation13], 4294965248  ;;  %v977_v1 = vmov 0   ;;  %v787_v2 = vld [vmem:[#allocation9 + $0x4] ss:$8 sps:$4 sm:$0xff]   ;;  %v82_v18 = vlaneseq  ;;  %v81_v28 = vld [vmem:[#allocation7] sm:$0xff] }
  0x4c   :  { %236 = vmatprep.mubr.bf16.mxu0 %v977_v1  ;;  %v789_v3 = vld [vmem:[#allocation9] ss:$8 sps:$4 sm:$0xff]   ;;  %204 = vmatprep.subr.bf16.mxu0 %v787_v2  ;;  %v790_v4 = vld [vmem:[#allocation9 + $0x14] ss:$8 sps:$4 sm:$0xff]   ;;  %v792_v5 = vld [vmem:[#allocation9 + $0x10] ss:$8 sps:$4 sm:$0xff]  }
  0x4d   :  { %205 = vmatpush1.bf16.msra.mxu0 %v789_v3  ;;  %v793_v6 = vld [vmem:[#allocation9 + $0x24] ss:$8 sps:$4 sm:$0xff]   ;;  %v795_v7 = vld [vmem:[#allocation9 + $0x20] ss:$8 sps:$4 sm:$0xff]   ;;  %v796_v8 = vld [vmem:[#allocation9 + $0x34] ss:$8 sps:$4 sm:$0xff]  }
  0x4e   :  { %206 = vmatprep.subr.bf16.mxu0 %v790_v4  ;;  %v798_v9 = vld [vmem:[#allocation9 + $0x30] ss:$8 sps:$4 sm:$0xff]   ;;  %v799_v10 = vld [vmem:[#allocation9 + $0x44] ss:$8 sps:$4 sm:$0xff]   ;;  %v813_v12 = vld [vmem:[#allocation11] ss:$8 sps:$4 sm:$0xff]  }
  0x4f   :  { %v811_v11 = vld [vmem:[#allocation11 + $0x4] ss:$8 sps:$4 sm:$0xff]   ;;  %v814_v13 = vld [vmem:[#allocation11 + $0x14] ss:$8 sps:$4 sm:$0xff]   ;;  %v801_v14 = vld [vmem:[#allocation9 + $0x40] ss:$8 sps:$4 sm:$0xff]  }
  0x50   :  { %457 = vmatprep.subr.bf16.mxu1 %v811_v11  ;;  %v816_v15 = vld [vmem:[#allocation11 + $0x10] ss:$8 sps:$4 sm:$0xff]   ;;  %v817_v16 = vld [vmem:[#allocation11 + $0x24] ss:$8 sps:$4 sm:$0xff]   ;;  %v802_v17 = vld [vmem:[#allocation9 + $0x54] ss:$8 sps:$4 sm:$0xff]  }
  0x51   :  { %207 = vmatpush1.bf16.msra.mxu0 %v792_v5  ;;  %458 = vmatpush1.bf16.msra.mxu1 %v813_v12  ;;  %v804_v19 = vld [vmem:[#allocation9 + $0x50] ss:$8 sps:$4 sm:$0xff]   ;;  %v819_v20 = vld [vmem:[#allocation11 + $0x20] ss:$8 sps:$4 sm:$0xff]   ;;  %v820_v21 = vld [vmem:[#allocation11 + $0x34] ss:$8 sps:$4 sm:$0xff]  }
  0x52   :  { %208 = vmatprep.subr.bf16.mxu0 %v793_v6  ;;  %459 = vmatprep.subr.bf16.mxu1 %v814_v13  ;;  %v805_v22 = vld [vmem:[#allocation9 + $0x64] ss:$8 sps:$4 sm:$0xff]   ;;  %v83_v23 = vand.u32 127, %v82_v18  ;;  %v807_v24 = vld [vmem:[#allocation9 + $0x60] ss:$8 sps:$4 sm:$0xff]   ;;  %v863_v59 = vld [vmem:[#allocation12 + $0x50] sm:$0xff]  }
  0x53   :  { %v808_v25 = vld [vmem:[#allocation9 + $0x74] ss:$8 sps:$4 sm:$0xff]   ;;  %v822_v26 = vld [vmem:[#allocation11 + $0x30] ss:$8 sps:$4 sm:$0xff]   ;;  %v823_v27 = vld [vmem:[#allocation11 + $0x44] ss:$8 sps:$4 sm:$0xff]  }
  0x54   :  { %vm85_vm0 = vcmp.lt.s32.totalorder %v83_v23, 17  ;;  %v810_v29 = vld [vmem:[#allocation9 + $0x70] ss:$8 sps:$4 sm:$0xff]   ;;  %v825_v30 = vld [vmem:[#allocation11 + $0x40] ss:$8 sps:$4 sm:$0xff]   ;;  %v115_v2 = vshrl.u32 %v82_v18, 7 }
  0x55   :  { %209 = vmatpush1.bf16.msra.mxu0 %v795_v7  ;;  %460 = vmatpush1.bf16.msra.mxu1 %v816_v15  ;;  %v86_v31 = vsel %vm85_vm0, %v81_v28, %v13_v0  ;;  %v826_v32 = vld [vmem:[#allocation11 + $0x54] ss:$8 sps:$4 sm:$0xff]   ;;  %v828_v33 = vld [vmem:[#allocation11 + $0x50] ss:$8 sps:$4 sm:$0xff]   ;;  %v829_v34 = vld [vmem:[#allocation11 + $0x64] ss:$8 sps:$4 sm:$0xff]  }
  0x56   :  { %210 = vmatprep.subr.bf16.mxu0 %v796_v8  ;;  %461 = vmatprep.subr.bf16.mxu1 %v817_v16  ;;  %v95_v35 = vpack.c.bf16 %v13_v0, %v86_v31  ;;  %v831_v36 = vld [vmem:[#allocation11 + $0x60] ss:$8 sps:$4 sm:$0xff]   ;;  %v832_v37 = vld [vmem:[#allocation11 + $0x74] ss:$8 sps:$4 sm:$0xff]   ;;  %v834_v38 = vld [vmem:[#allocation11 + $0x70] ss:$8 sps:$4 sm:$0xff]  }
  0x57   :  { %v835_v39 = vld [vmem:[#allocation11 + $0x84] ss:$8 sps:$4 sm:$0xff]   ;;  %v837_v40 = vld [vmem:[#allocation11 + $0x80] ss:$8 sps:$4 sm:$0xff]   ;;  %v838_v41 = vld [vmem:[#allocation11 + $0x94] ss:$8 sps:$4 sm:$0xff]  }
  0x58   :  { %v840_v42 = vld [vmem:[#allocation11 + $0x90] ss:$8 sps:$4 sm:$0xff]   ;;  %v841_v43 = vld [vmem:[#allocation11 + $0xa4] ss:$8 sps:$4 sm:$0xff]   ;;  %v843_v44 = vld [vmem:[#allocation11 + $0xa0] ss:$8 sps:$4 sm:$0xff]  }
  0x59   :  { %211 = vmatpush1.bf16.msra.mxu0 %v798_v9  ;;  %462 = vmatpush1.bf16.msra.mxu1 %v819_v20  ;;  %v844_v45 = vld [vmem:[#allocation11 + $0xb4] ss:$8 sps:$4 sm:$0xff]   ;;  %v846_v46 = vld [vmem:[#allocation11 + $0xb0] ss:$8 sps:$4 sm:$0xff]   ;;  %v847_v47 = vld [vmem:[#allocation11 + $0xc4] ss:$8 sps:$4 sm:$0xff]  }
  0x5a   :  { %212 = vmatprep.subr.bf16.mxu0 %v799_v10  ;;  %463 = vmatprep.subr.bf16.mxu1 %v820_v21  ;;  %v849_v48 = vld [vmem:[#allocation11 + $0xc0] ss:$8 sps:$4 sm:$0xff]   ;;  %v850_v49 = vld [vmem:[#allocation11 + $0xd4] ss:$8 sps:$4 sm:$0xff]   ;;  %v852_v50 = vld [vmem:[#allocation11 + $0xd0] ss:$8 sps:$4 sm:$0xff]  }
  0x5b   :  { %v853_v51 = vld [vmem:[#allocation11 + $0xe4] ss:$8 sps:$4 sm:$0xff]   ;;  %v855_v52 = vld [vmem:[#allocation11 + $0xe0] ss:$8 sps:$4 sm:$0xff]   ;;  %v856_v53 = vld [vmem:[#allocation11 + $0xf4] ss:$8 sps:$4 sm:$0xff]  }
  0x5c   :  { %v858_v54 = vld [vmem:[#allocation11 + $0xf0] ss:$8 sps:$4 sm:$0xff]   ;;  %v859_v55 = vld [vmem:[#allocation12 + $0x40] sm:$0xff]   ;;  %v861_v57 = vld [vmem:[#allocation12 + $0x48] sm:$0xff]   ;;  %v116_v3 = vsub.s32 0, %v115_v2  ;;  %v120_v5 = vsub.s32 1, %v115_v2 }
  0x5d   :  { %213 = vmatpush1.bf16.msra.mxu0 %v801_v14  ;;  %464 = vmatpush1.bf16.msra.mxu1 %v822_v26  ;;  %v860_v56 = vld [vmem:[#allocation12] sm:$0xff]   ;;  %v862_v58 = vld [vmem:[#allocation12 + $0x8] sm:$0xff]   ;;  %v864_v60 = vld [vmem:[#allocation12 + $0x10] sm:$0xff]  }
  0x5e   :  { %214 = vmatprep.subr.bf16.mxu0 %v802_v17  ;;  %465 = vmatprep.subr.bf16.mxu1 %v823_v27  ;;  %v865_v61 = vld [vmem:[#allocation12 + $0x58] sm:$0xff]   ;;  %v867_v63 = vld [vmem:[#allocation12 + $0x60] sm:$0xff]   ;;  %v869_v1 = vld [vmem:[#allocation12 + $0x68] sm:$0xff]  }
  0x5f   :  { %v866_v62 = vld [vmem:[#allocation12 + $0x18] sm:$0xff]   ;;  %v868_v0 = vld [vmem:[#allocation12 + $0x20] sm:$0xff]   ;;  %v871_v23 = vld [vmem:[#allocation12 + $0x70] sm:$0xff]  }
  0x60   :  { %v112_v4 = vld [vmem:[%s1106_s1] sm:$0x3] }
  0x61   :  { %215 = vmatpush1.bf16.msra.mxu0 %v804_v19  ;;  %466 = vmatpush1.bf16.msra.mxu1 %v825_v30  ;;  %v117_v6 = vrot.slane %v112_v4, %v116_v3  ;;  %v121_v7 = vrot.slane %v112_v4, %v120_v5  ;;  %v874_v26 = vld [vmem:[#allocation12 + $0x38] sm:$0xff]  }
  0x62   :  { %216 = vmatprep.subr.bf16.mxu0 %v805_v22  ;;  %467 = vmatprep.subr.bf16.mxu1 %v826_v32  ;;  %v870_v22 = vld [vmem:[#allocation12 + $0x28] sm:$0xff]   ;;  %v285_v27 = vld [vmem:[%s1108_s3] sm:$0x3] }
  0x63   :  { %v290_v28 = vrot.slane %v285_v27, %v116_v3 }
  0x65   :  { %217 = vmatpush1.bf16.msra.mxu0 %v807_v24  ;;  %468 = vmatpush1.bf16.msra.mxu1 %v828_v33  ;;  %v872_v24 = vld [vmem:[#allocation12 + $0x30] sm:$0xff]  }
  0x66   :  { %218 = vmatprep.subr.bf16.mxu0 %v808_v25  ;;  %469 = vmatprep.subr.bf16.mxu1 %v829_v34  ;;  %v873_v25 = vld [vmem:[#allocation12 + $0x78] sm:$0xff]  }
  0x69   :  { %219 = vmatpush1.bf16.msra.mxu0 %v810_v29  ;;  %470 = vmatpush1.bf16.msra.mxu1 %v831_v36  ;;  %v294_v29 = vrot.slane %v285_v27, %v120_v5 }
  0x6a   :  { %471 = vmatprep.subr.bf16.mxu1 %v832_v37  ;;  %756 = vmatprep.subr.bf16.mxu0 %v859_v55 }
  0x6c   :  { %237 = vmatmul.mubr.bf16.vlgmr.msra.gmra.mrb[0].mxu0 %v95_v35 }
  0x6d   :  { %472 = vmatpush1.bf16.msra.mxu1 %v834_v38  ;;  %757 = vmatpush3.bf16.msra.mxu0 %v860_v56 }
  0x6e   :  { %473 = vmatprep.subr.bf16.mxu1 %v835_v39  ;;  %758 = vmatprep.subr.bf16.mxu0 %v861_v57 }
  0x71   :  { %474 = vmatpush1.bf16.msra.mxu1 %v837_v40  ;;  %759 = vmatpush3.bf16.msra.mxu0 %v862_v58 }
  0x72   :  { %475 = vmatprep.subr.bf16.mxu1 %v838_v41  ;;  %760 = vmatprep.subr.bf16.mxu0 %v863_v59 }
  0x75   :  { %476 = vmatpush1.bf16.msra.mxu1 %v840_v42  ;;  %761 = vmatpush3.bf16.msra.mxu0 %v864_v60 }
  0x76   :  { %477 = vmatprep.subr.bf16.mxu1 %v841_v43  ;;  %762 = vmatprep.subr.bf16.mxu0 %v865_v61 }
  0x79   :  { %478 = vmatpush1.bf16.msra.mxu1 %v843_v44  ;;  %763 = vmatpush3.bf16.msra.mxu0 %v866_v62 }
  0x7a   :  { %479 = vmatprep.subr.bf16.mxu1 %v844_v45  ;;  %764 = vmatprep.subr.bf16.mxu0 %v867_v63  ;;  %v739_v45 = vld [vmem:[%s1110_s5] ss:$0 sm:$0xff] }
  0x7d   :  { %480 = vmatpush1.bf16.msra.mxu1 %v846_v46  ;;  %765 = vmatpush3.bf16.msra.mxu0 %v868_v0 }
  0x7e   :  { %481 = vmatprep.subr.bf16.mxu1 %v847_v47  ;;  %766 = vmatprep.subr.bf16.mxu0 %v869_v1 }
  0x81   :  { %482 = vmatpush1.bf16.msra.mxu1 %v849_v48  ;;  %767 = vmatpush3.bf16.msra.mxu0 %v870_v22 }
  0x82   :  { %483 = vmatprep.subr.bf16.mxu1 %v850_v49  ;;  %768 = vmatprep.subr.bf16.mxu0 %v871_v23 }
  0x85   :  { %484 = vmatpush1.bf16.msra.mxu1 %v852_v50  ;;  %769 = vmatpush3.bf16.msra.mxu0 %v872_v24 }
  0x86   :  { %485 = vmatprep.subr.bf16.mxu1 %v853_v51  ;;  %770 = vmatprep.subr.bf16.mxu0 %v873_v25 }
  0x89   :  { %486 = vmatpush1.bf16.msra.mxu1 %v855_v52  ;;  %771 = vmatpush3.bf16.msra.mxu0 %v874_v26 }
  0x8a   :  { %487 = vmatprep.subr.bf16.mxu1 %v856_v53 }
  0x8d   :  { %488 = vmatpush1.bf16.msra.mxu1 %v858_v54 }
 0x13f   :  { %v238_v8 = vpop.f32.mrb[0].mxu0 }
 0x140   :  { %v239_v9 = vadd.f32 %v238_v8, %v117_v6  ;;  %v240_v10 = vpop.f32.mrb[1].mxu0 }
 0x141   :  { %v241_v11 = vadd.f32 %v240_v10, %v121_v7  ;;  %v242_v12 = vpop.f32.mrb[2].mxu0 }
 0x142   :  { %v243_v13 = vadd.f32 %v242_v12, %v117_v6  ;;  %v244_v14 = vpop.f32.mrb[3].mxu0  ;;  %v247_v16 = vmax.f32 %v239_v9, 0.0 }
 0x143   :  { %v245_v15 = vadd.f32 %v244_v14, %v121_v7  ;;  %v248_v19 = vmax.f32 %v241_v11, 0.0 }
 0x144   :  { %v249_v17 = vmax.f32 %v243_v13, 0.0 }
 0x145   :  { %v250_v18 = vmax.f32 %v245_v15, 0.0 }
 0x146   :  { %v251_v20 = vpack.c.bf16 %v249_v17, %v247_v16 }
 0x147   :  { %v252_v21 = vpack.c.bf16 %v250_v18, %v248_v19 }
 0x149   :  { %489 = vmatprep.mubr.bf16.mxu1 %v252_v21 }
 0x14a   :  { %490 = vmatmul.mubr.bf16.vlgmr.msra.gmra.mrb[0].mxu1 %v251_v20 }
 0x21d   :  { %v491_v30 = vpop.f32.mrb[0].mxu1 }
 0x21e   :  { %v492_v31 = vadd.f32 %v491_v30, %v290_v28  ;;  %v493_v32 = vpop.f32.mrb[1].mxu1 }
 0x21f   :  { %v494_v33 = vadd.f32 %v493_v32, %v294_v29  ;;  %v495_v34 = vpop.f32.mrb[2].mxu1 }
 0x220   :  { %v496_v35 = vadd.f32 %v495_v34, %v290_v28  ;;  %v497_v36 = vpop.f32.mrb[3].mxu1  ;;  %v500_v38 = vmax.f32 %v492_v31, 0.0 }
 0x221   :  { %v498_v37 = vadd.f32 %v497_v36, %v294_v29  ;;  %v501_v40 = vmax.f32 %v494_v33, 0.0 }
 0x222   :  { %v502_v39 = vmax.f32 %v496_v35, 0.0 }
 0x223   :  { %v503_v41 = vmax.f32 %v498_v37, 0.0 }
 0x224   :  { %v504_v42 = vpack.c.bf16 %v502_v39, %v500_v38 }
 0x225   :  { %v505_v43 = vpack.c.bf16 %v503_v41, %v501_v40 }
 0x227   :  { %673 = vmatprep.mubr.bf16.mxu0 %v505_v43 }
 0x228   :  { %674 = vmatmul.mubr.bf16.vlgmr.msra.gmra.mrb[4].mxu0 %v504_v42 }
 0x2fb   :  { %v772_v44 = vpop.f32.mrb[4].mxu0 }
 0x2fc   :  { %v773_v46 = vpop.f32.mrb[5].mxu0 }
 0x2fd   :  { %v774_v47 = vadd.f32 %v773_v46, %v772_v44  ;;  %v775_v48 = vpop.f32.mrb[6].mxu0 }
 0x2fe   :  { %v776_v49 = vpop.f32.mrb[7].mxu0 }
 0x2ff   :  { %v676_v50 = vadd.f32 %v774_v47, %v739_v45  ;;  %v777_v51 = vadd.f32 %v776_v49, %v775_v48 }
 0x301   :  { %682 = vst [vmem:[%s1113_s8] sm:$0xff] %v676_v50  ;;  %v679_v52 = vadd.f32 %v777_v51, %v739_v45 }
 0x303   :  { %683 = vst [vmem:[%s1113_s8 + $0x8] sm:$0xff] %v679_v52 }
 0x304   :  { %688 = vsyncpa [#allocation8], 1 }
 0x305   :  { %689 = vsyncpa [#allocation10], 1 }
 0x306   :  { %690 = vsyncpa [#allocation13], 1 }

</bundles_post_ra>
